<compile_context>
chip_gen: v5e
topology: v5e:2x2
jax: 0.10.0
libtpu: 0.0.40
codegen_flags: <defaults>
</compile_context>

<pallas_src>
import math

import jax
import jax.numpy as jnp
from jax import lax
from jax.experimental import pallas as pl
from jax.experimental.pallas import tpu as pltpu


def _round_up(n, m):
    return ((n + m - 1) // m) * m


def _critic_kernel(x_ref, w1_ref, b1_ref, w2_ref, b2_ref, w3t_ref, b3_ref, o_ref):
    neg_slope = 0.01

    # fc1 + leaky_relu  (f32 operands, f32 MXU accumulation)
    h = jnp.dot(x_ref[...], w1_ref[...],
                preferred_element_type=jnp.float32) + b1_ref[...]
    h = jnp.maximum(h, neg_slope * h)

    # fc2 + leaky_relu
    h = jnp.dot(h, w2_ref[...],
                preferred_element_type=jnp.float32) + b2_ref[...]
    h = jnp.maximum(h, neg_slope * h)

    # fc3 head, computed transposed so the output block is lane-dense:
    #   q^T = W3^T @ h2^T  ->  (out_pad, tb)   (A @ B^T contraction pattern)
    q_t = lax.dot_general(
        w3t_ref[...], h,
        dimension_numbers=(((1,), (1,)), ((), ())),
        preferred_element_type=jnp.float32,
    )
    o_ref[...] = (q_t + b3_ref[...]).astype(o_ref.dtype)


def critic_forward(x, params, *, tile_b=2048):
    """x: (B, input_dim) float32.  params: kernel-ready dict from init_critic_params."""
    w1, b1 = params["w1"], params["b1"]
    w2, b2 = params["w2"], params["b2"]
    w3t, b3 = params["w3t"], params["b3"]          # (out_pad, hidden), (out_pad, 1)
    out_dim = int(params["out_dim"])

    B, in_dim = x.shape
    hidden = w1.shape[1]
    out_pad = w3t.shape[0]                          # out_dim rounded up to 8

    # --- batch tile selection ------------------------------------------------
    # Small batch: one block that exactly covers the batch (full-dim blocks are
    # always legal, zero padding waste).  Large batch: lane-friendly multiple
    # of 256, sized so the grid has >= 2 steps (v7x megacore), capped by tile_b.
    if B <= 512:
        tb = B
    else:
        tb = max(256, min(tile_b, _round_up(pl.cdiv(B, 2), 256)))
    grid = (pl.cdiv(B, tb),)

    flops = 2 * B * (in_dim * hidden + hidden * hidden + hidden * out_dim)
    bytes_accessed = (
        B * in_dim * 4                              # x read
        + B * out_pad * 4                           # output write
        + (w1.size + b1.size + w2.size + b2.size + w3t.size + b3.size) * 4
    )
    cost = pl.CostEstimate(flops=flops, transcendentals=0,
                           bytes_accessed=bytes_accessed)

    out_t = pl.pallas_call(
        _critic_kernel,
        out_shape=jax.ShapeDtypeStruct((out_pad, B), jnp.float32),
        grid=grid,
        in_specs=[
            pl.BlockSpec((tb, in_dim), lambda i: (i, 0)),       # x tile (pipelined)
            pl.BlockSpec((in_dim, hidden), lambda i: (0, 0)),   # W1 (resident)
            pl.BlockSpec((1, hidden), lambda i: (0, 0)),        # b1
            pl.BlockSpec((hidden, hidden), lambda i: (0, 0)),   # W2
            pl.BlockSpec((1, hidden), lambda i: (0, 0)),        # b2
            pl.BlockSpec((out_pad, hidden), lambda i: (0, 0)),  # W3^T (padded rows)
            pl.BlockSpec((out_pad, 1), lambda i: (0, 0)),       # b3
        ],
        out_specs=pl.BlockSpec((out_pad, tb), lambda i: (0, i)),
        compiler_params=pltpu.CompilerParams(
            dimension_semantics=("parallel",),
        ),
        cost_estimate=cost,
    )(x.astype(jnp.float32), w1, b1, w2, b2, w3t, b3)

    # (out_pad, B) -> (B, out_dim): drop the padded head rows, transpose back.
    return out_t[:out_dim, :].T


def _xavier_uniform(key, fan_in, fan_out, gain, shape):
    # Matches torch.nn.init.xavier_uniform_ (bound from fan_in/fan_out of the
    # torch (out, in) weight); `shape` is the storage layout we want.
    bound = gain * math.sqrt(6.0 / (fan_in + fan_out))
    return jax.random.uniform(key, shape, jnp.float32, -bound, bound)


def init_critic_params(key, input_dim, output_dim=1, mlp_layer_size=64):
    """One-time parameter preparation (hoisted out of the forward path).

    W1/W2 are stored as (in, out) so the kernel computes x @ W; the head is
    stored transposed as (out_pad, hidden) with out_pad = round_up(out, 8) so
    the kernel can emit a lane-dense transposed output block.
    """
    gain_lrelu = math.sqrt(2.0 / (1.0 + 0.01 ** 2))   # calculate_gain('leaky_relu')
    gain_linear = 1.0                                  # calculate_gain('linear')
    out_pad = _round_up(output_dim, 8)

    k1, k2, k3 = jax.random.split(key, 3)
    w3t = jnp.zeros((out_pad, mlp_layer_size), jnp.float32).at[:output_dim].set(
        _xavier_uniform(k3, mlp_layer_size, output_dim, gain_linear,
                        (output_dim, mlp_layer_size)))
    return {
        "w1": _xavier_uniform(k1, input_dim, mlp_layer_size, gain_lrelu,
                              (input_dim, mlp_layer_size)),
        "b1": jnp.zeros((1, mlp_layer_size), jnp.float32),
        "w2": _xavier_uniform(k2, mlp_layer_size, mlp_layer_size, gain_lrelu,
                              (mlp_layer_size, mlp_layer_size)),
        "b2": jnp.zeros((1, mlp_layer_size), jnp.float32),
        "w3t": w3t,
        "b3": jnp.zeros((out_pad, 1), jnp.float32),
        "out_dim": output_dim,
    }


def _ref_forward(x, p):
    out_dim = int(p["out_dim"])
    h = x @ p["w1"] + p["b1"]
    h = jnp.where(h > 0, h, 0.01 * h)
    h = h @ p["w2"] + p["b2"]
    h = jnp.where(h > 0, h, 0.01 * h)
    return h @ p["w3t"][:out_dim].T + p["b3"][:out_dim].T


if __name__ == "__main__":
    key = jax.random.PRNGKey(0)
    k_param, k_x1, k_x2 = jax.random.split(key, 3)

    input_dim = 32
    mlp_layer_size = 64
    output_dim = 1

    params = init_critic_params(k_param, input_dim, output_dim, mlp_layer_size)

    # Small-shape check (single full-batch block, grid = 1).
    batch = 8
    x = jax.random.normal(k_x1, (batch, input_dim), dtype=jnp.float32)
    q = critic_forward(x, params)
    jax.block_until_ready(q)
    q_ref = _ref_forward(x, params)
    assert q.shape == (batch, output_dim)
    assert jnp.allclose(q, q_ref, atol=2e-3, rtol=2e-3), float(
        jnp.max(jnp.abs(q - q_ref))
    )

    # Multi-tile check with a partial final block (B=600, tb=512 -> grid=2).
    batch2 = 600
    x2 = jax.random.normal(k_x2, (batch2, input_dim), dtype=jnp.float32)
    q2 = critic_forward(x2, params)
    jax.block_until_ready(q2)
    q2_ref = _ref_forward(x2, params)
    assert q2.shape == (batch2, output_dim)
    assert jnp.allclose(q2, q2_ref, atol=2e-3, rtol=2e-3), float(
        jnp.max(jnp.abs(q2 - q2_ref))
    )

    # Same batch with a smaller tile (tb=256 -> grid=3, masked final block).
    q3 = critic_forward(x2, params, tile_b=256)
    jax.block_until_ready(q3)
    assert q3.shape == (batch2, output_dim)
    assert jnp.allclose(q3, q2_ref, atol=2e-3, rtol=2e-3), float(
        jnp.max(jnp.abs(q3 - q2_ref))
    )

    print("KERNEL_OK")
</pallas_src>

<mosaic_0001>
module attributes {stable_mosaic.version = 11 : i64} {
  func.func @_critic_kernel(%arg0: i32, %arg1: memref<8x32xf32, #tpu.memory_space<vmem>>, %arg2: memref<32x64xf32, #tpu.memory_space<vmem>>, %arg3: memref<1x64xf32, #tpu.memory_space<vmem>>, %arg4: memref<64x64xf32, #tpu.memory_space<vmem>>, %arg5: memref<1x64xf32, #tpu.memory_space<vmem>>, %arg6: memref<8x64xf32, #tpu.memory_space<vmem>>, %arg7: memref<8x1xf32, #tpu.memory_space<vmem>>, %arg8: memref<8x8xf32, #tpu.memory_space<vmem>>) attributes {dimension_semantics = [#tpu.dimension_semantics<parallel>], iteration_bounds = array<i64: 1>, scalar_prefetch = 0 : i64, scratch_operands = 0 : i64, tpu.core_type = #tpu.core_type<tc>, window_params = [{transform_indices = @transform_0, window_bounds = array<i64: 8, 32>}, {pipeline_mode = #tpu.pipeline_mode<synchronous>, transform_indices = @transform_1, window_bounds = array<i64: 32, 64>}, {pipeline_mode = #tpu.pipeline_mode<synchronous>, transform_indices = @transform_2, window_bounds = array<i64: 1, 64>}, {pipeline_mode = #tpu.pipeline_mode<synchronous>, transform_indices = @transform_3, window_bounds = array<i64: 64, 64>}, {pipeline_mode = #tpu.pipeline_mode<synchronous>, transform_indices = @transform_4, window_bounds = array<i64: 1, 64>}, {pipeline_mode = #tpu.pipeline_mode<synchronous>, transform_indices = @transform_5, window_bounds = array<i64: 8, 64>}, {pipeline_mode = #tpu.pipeline_mode<synchronous>, transform_indices = @transform_6, window_bounds = array<i64: 8, 1>}, {transform_indices = @transform_7, window_bounds = array<i64: 8, 8>}]} {
    %c0 = arith.constant 0 : index
    %c0_0 = arith.constant 0 : index
    %0 = vector.load %arg1[%c0, %c0_0] : memref<8x32xf32, #tpu.memory_space<vmem>>, vector<8x32xf32>
    %c0_1 = arith.constant 0 : index
    %c0_2 = arith.constant 0 : index
    %1 = vector.load %arg2[%c0_1, %c0_2] : memref<32x64xf32, #tpu.memory_space<vmem>>, vector<32x64xf32>
    %cst = arith.constant dense<0.000000e+00> : vector<8x64xf32>
    %2 = tpu.matmul %0, %1, %cst {dimension_numbers = #tpu.dot_dimension_numbers<[1], [0], [0], [1], [0, 0, 1, 1], [], []>} : vector<8x32xf32>, vector<32x64xf32>, vector<8x64xf32> -> vector<8x64xf32>
    %c0_3 = arith.constant 0 : index
    %c0_4 = arith.constant 0 : index
    %3 = vector.load %arg3[%c0_3, %c0_4] : memref<1x64xf32, #tpu.memory_space<vmem>>, vector<1x64xf32>
    %4 = vector.broadcast %3 : vector<1x64xf32> to vector<8x64xf32>
    %5 = arith.addf %2, %4 : vector<8x64xf32>
    %cst_5 = arith.constant 0.00999999977 : f32
    %6 = vector.broadcast %cst_5 : f32 to vector<8x64xf32>
    %7 = arith.mulf %6, %5 : vector<8x64xf32>
    %8 = arith.maximumf %5, %7 : vector<8x64xf32>
    %c0_6 = arith.constant 0 : index
    %c0_7 = arith.constant 0 : index
    %9 = vector.load %arg4[%c0_6, %c0_7] : memref<64x64xf32, #tpu.memory_space<vmem>>, vector<64x64xf32>
    %cst_8 = arith.constant dense<0.000000e+00> : vector<8x64xf32>
    %10 = tpu.matmul %8, %9, %cst_8 {dimension_numbers = #tpu.dot_dimension_numbers<[1], [0], [0], [1], [0, 0, 1, 1], [], []>} : vector<8x64xf32>, vector<64x64xf32>, vector<8x64xf32> -> vector<8x64xf32>
    %c0_9 = arith.constant 0 : index
    %c0_10 = arith.constant 0 : index
    %11 = vector.load %arg5[%c0_9, %c0_10] : memref<1x64xf32, #tpu.memory_space<vmem>>, vector<1x64xf32>
    %12 = vector.broadcast %11 : vector<1x64xf32> to vector<8x64xf32>
    %13 = arith.addf %10, %12 : vector<8x64xf32>
    %cst_11 = arith.constant 0.00999999977 : f32
    %14 = vector.broadcast %cst_11 : f32 to vector<8x64xf32>
    %15 = arith.mulf %14, %13 : vector<8x64xf32>
    %16 = arith.maximumf %13, %15 : vector<8x64xf32>
    %c0_12 = arith.constant 0 : index
    %c0_13 = arith.constant 0 : index
    %17 = vector.load %arg6[%c0_12, %c0_13] : memref<8x64xf32, #tpu.memory_space<vmem>>, vector<8x64xf32>
    %cst_14 = arith.constant dense<0.000000e+00> : vector<8x8xf32>
    %18 = tpu.matmul %17, %16, %cst_14 {dimension_numbers = #tpu.dot_dimension_numbers<[1], [1], [0], [0], [0, 0, 1, 0], [], []>} : vector<8x64xf32>, vector<8x64xf32>, vector<8x8xf32> -> vector<8x8xf32>
    %c0_15 = arith.constant 0 : index
    %c0_16 = arith.constant 0 : index
    %19 = vector.load %arg7[%c0_15, %c0_16] : memref<8x1xf32, #tpu.memory_space<vmem>>, vector<8x1xf32>
    %20 = vector.broadcast %19 : vector<8x1xf32> to vector<8x8xf32>
    %21 = arith.addf %18, %20 : vector<8x8xf32>
    %c0_17 = arith.constant 0 : index
    %c0_18 = arith.constant 0 : index
    %22 = vector.load %arg8[%c0_17, %c0_18] : memref<8x8xf32, #tpu.memory_space<vmem>>, vector<8x8xf32>
    tpu.vector_store %arg8[%c0_17, %c0_18], %21 {strides = array<i32>} : memref<8x8xf32, #tpu.memory_space<vmem>>, vector<8x8xf32>,
    return
  }
  func.func @transform_0(%arg0: i32) -> (i32, i32) {
    %c0_i32 = arith.constant 0 : i32
    %c0_i32_0 = arith.constant 0 : i32
    return %arg0, %c0_i32 : i32, i32
  }
  func.func @transform_1(%arg0: i32) -> (i32, i32) {
    %c0_i32 = arith.constant 0 : i32
    %c0_i32_0 = arith.constant 0 : i32
    %c0_i32_1 = arith.constant 0 : i32
    return %c0_i32, %c0_i32_0 : i32, i32
  }
  func.func @transform_2(%arg0: i32) -> (i32, i32) {
    %c0_i32 = arith.constant 0 : i32
    %c0_i32_0 = arith.constant 0 : i32
    %c0_i32_1 = arith.constant 0 : i32
    return %c0_i32, %c0_i32_0 : i32, i32
  }
  func.func @transform_3(%arg0: i32) -> (i32, i32) {
    %c0_i32 = arith.constant 0 : i32
    %c0_i32_0 = arith.constant 0 : i32
    %c0_i32_1 = arith.constant 0 : i32
    return %c0_i32, %c0_i32_0 : i32, i32
  }
  func.func @transform_4(%arg0: i32) -> (i32, i32) {
    %c0_i32 = arith.constant 0 : i32
    %c0_i32_0 = arith.constant 0 : i32
    %c0_i32_1 = arith.constant 0 : i32
    return %c0_i32, %c0_i32_0 : i32, i32
  }
  func.func @transform_5(%arg0: i32) -> (i32, i32) {
    %c0_i32 = arith.constant 0 : i32
    %c0_i32_0 = arith.constant 0 : i32
    %c0_i32_1 = arith.constant 0 : i32
    return %c0_i32, %c0_i32_0 : i32, i32
  }
  func.func @transform_6(%arg0: i32) -> (i32, i32) {
    %c0_i32 = arith.constant 0 : i32
    %c0_i32_0 = arith.constant 0 : i32
    %c0_i32_1 = arith.constant 0 : i32
    return %c0_i32, %c0_i32_0 : i32, i32
  }
  func.func @transform_7(%arg0: i32) -> (i32, i32) {
    %c0_i32 = arith.constant 0 : i32
    %c0_i32_0 = arith.constant 0 : i32
    return %c0_i32, %arg0 : i32, i32
  }
}

</mosaic_0001>

<bundles_post_ra>
// kernel: tpu_custom_call.1
= control target key start
LH: loop header
LB: loop body
LE: loop exit
PB: predicated region body
PF: predicated region fallthrough
CT: control target
= control target key end

     0   :  { %12 = vsyncpa [#allocation3], 0  ;;  %s385_s0 = inlined_call_operand.vmem [shape: f32[8,32], index: 0, kind: input, shape index: {}]   ;;  %s386_s1 = inlined_call_operand.hbm [shape: f32[32,64], index: 1, kind: input, shape index: {}]   ;;  %s387_s2 = inlined_call_operand.vmem [shape: f32[1,64], index: 2, kind: input, shape index: {}]   ;;  %s388_s3 = inlined_call_operand.hbm [shape: f32[64,64], index: 3, kind: input, shape index: {}]   ;;  %s389_s4 = inlined_call_operand.vmem [shape: f32[1,64], index: 4, kind: input, shape index: {}]   ;;  %s390_s5 = inlined_call_operand.hbm [shape: f32[8,64], index: 5, kind: input, shape index: {}]   ;;  %s391_s6 = inlined_call_operand.vmem [shape: f32[8,1], index: 6, kind: input, shape index: {}]   ;;  %s392_s7 = inlined_call_operand.hbm [shape: f32[8,8], index: 7, kind: output, shape index: {}]  }
   0x1   :  { %13 = vsyncpa [#allocation6], 0 }
   0x2   :  { %14 = vsyncpa [#allocation4], 0  ;;  %s36_s26 = sshll.u32 %s388_s3, 4  ;;  %s314_s27 = smov [#allocation5]   ;;  %s37_s26 = int_to_ptr.hbm [resolvable:$true] %s36_s26 }
   0x3   :  { %s38_s28 = sshll.u32 %s314_s27, 4  ;;  %s21_s8 = sshll.u32 %s386_s1, 4  ;;  %s39_s28 = int_to_ptr.vmem [resolvable:$true] %s38_s28  ;;  %s22_s8 = int_to_ptr.hbm [resolvable:$true] %s21_s8 }
   0x4   :  { %s315_s9 = smov 128   ;;  %s316_s10 = smov 8  }
   0x5   :  { %44 = dma.hbm_to_vmem [thread:$0]  %s37_s26, 1024, %s39_s28, [#allocation6], %s315_s9, %s315_s9, %s316_s10  }
   0x6   :  { %s317_s11 = smov [#allocation2]   ;;  %s52_s15 = sshll.u32 %s390_s5, 4  ;;  %s53_s15 = int_to_ptr.hbm [resolvable:$true] %s52_s15 }
   0x7   :  { %s23_s12 = sshll.u32 %s317_s11, 4  ;;  %s318_s3 = smov [#allocation7]   ;;  %s24_s12 = int_to_ptr.vmem [resolvable:$true] %s23_s12 }
   0x8   :  { %29 = dma.hbm_to_vmem [thread:$0]  %s22_s8, 512, %s24_s12, [#allocation3], %s315_s9, %s315_s9, %s316_s10  }
   0x9   :  { %s54_s16 = sshll.u32 %s318_s3, 4  ;;  %s55_s16 = int_to_ptr.vmem [resolvable:$true] %s54_s16 }
   0xa   :  { %57 = dma.hbm_to_vmem [thread:$0]  %s53_s15, 128, %s55_s16, [#allocation6]  }
   0xb   :  { %308 = dma.done.wait [#allocation3], 512  }
   0xc   :  { %309 = vsyncadd [#allocation3], 4294966784 }
   0xd   :  { %310 = dma.done.wait [#allocation6], 1152  }
   0xe   :  { %311 = vsyncadd [#allocation6], 4294966144  ;;  %v76_v0 = vld [vmem:[#allocation2 + $0x18] sm:$0xff]  ;;  %v75_v1 = vld [vmem:[#allocation2 + $0x10] sm:$0xff]  ;;  %vm81_vm0 = vcmask 261120   ;;  %vm119_vm1 = vcmask 523264  }
   0xf   :  { %97 = vmatpush.msra.mxu0 %v76_v0  ;;  %v114_v2 = vld [vmem:[#allocation5 + $0x38] sm:$0xff]  ;;  %v74_v3 = vld [vmem:[#allocation2 + $0x8] sm:$0xff]  ;;  %v113_v4 = vld [vmem:[#allocation5 + $0x30] sm:$0xff]  ;;  %v319_v19 = vmov 0   ;;  %vm178_vm2 = vcmask 64512  }
  0x10   :  { %131 = vmatpush.msra.mxu1 %v114_v2  ;;  %v112_v5 = vld [vmem:[#allocation5 + $0x28] sm:$0xff]  ;;  %v73_v6 = vld [vmem:[#allocation2] sm:$0xff]  ;;  %v110_v9 = vld [vmem:[#allocation5 + $0x18] sm:$0xff]  ;;  %209 = vset.pattern.permute.xlu0 %v319_v19 }
  0x11   :  { %98 = vmatpush.msra.mxu0 %v75_v1  ;;  %v72_v7 = vld [vmem:[%s385_s0] sm:$0xff]  ;;  %v109_v10 = vld [vmem:[#allocation5 + $0x10] sm:$0xff]  ;;  %v108_v11 = vld [vmem:[#allocation5 + $0x8] sm:$0xff] }
  0x12   :  { %132 = vmatpush.msra.mxu1 %v113_v4  ;;  %v111_v8 = vld [vmem:[#allocation5 + $0x20] sm:$0xff] }
  0x13   :  { %99 = vmatpush.msra.mxu0 %v74_v3  ;;  %v107_v12 = vld [vmem:[#allocation5] sm:$0xff] }
  0x14   :  { %133 = vmatpush.msra.mxu1 %v112_v5  ;;  %v210_v13 = vld [vmem:[%s387_s2] ss:$0 sm:$0xff]  ;;  %s320_s2 = smov [#allocation8]  }
  0x15   :  { %100 = vmatpush.msra.mxu0 %v73_v6  ;;  %v146_v18 = vld [vmem:[%s391_s6] sm:$0xff]  ;;  %s185_s22 = sshll.u32 %s320_s2, 4  ;;  %s187_s6 = sshll.u32 %s392_s7, 4  ;;  %s186_s22 = int_to_ptr.vmem [resolvable:$true] %s185_s22  ;;  %s188_s6 = int_to_ptr.hbm [resolvable:$true] %s187_s6 }
  0x16   :  { %198 = vmatmul.msk.f32.vlgmr.msra.gmra.mxu0 %vm81_vm0, %v72_v7  ;;  %134 = vmatpush.msra.mxu1 %v111_v8  ;;  %v211_v20 = vld [vmem:[%s389_s4] ss:$0 sm:$0xff] }
  0x17   :  { %149 = vperm.xlu0 %209, %v146_v18   ;;  %v145_v25 = vld [vmem:[#allocation7] sm:$0xff] }
  0x18   :  { %135 = vmatpush.msra.mxu1 %v110_v9 }
  0x1a   :  { %136 = vmatpush.msra.mxu1 %v109_v10 }
  0x1c   :  { %137 = vmatpush.msra.mxu1 %v108_v11 }
  0x1e   :  { %138 = vmatpush.msra.mxu1 %v107_v12 }
  0x89   :  { %v150_v26 = vpop.permute.xlu0 %149 }
  0x93   :  { %v102_v14 = vpop.f32.mrf.mxu0 }
  0x94   :  { %v103_v15 = vadd.f32 %v210_v13, %v102_v14 }
  0x96   :  { %v105_v16 = vmul.f32 0.01, %v103_v15 }
  0x98   :  { %v106_v17 = vmax.f32 %v103_v15, %v105_v16 }
  0x9a   :  { %199 = vmatmul.msk.f32.vlgmr.msra.gmra.mxu1 %vm119_vm1, %v106_v17 }
 0x117   :  { %v140_v21 = vpop.f32.mrf.mxu1 }
 0x118   :  { %v141_v22 = vadd.f32 %v211_v20, %v140_v21 }
 0x11a   :  { %v143_v23 = vmul.f32 0.01, %v141_v22 }
 0x11c   :  { %v144_v24 = vmax.f32 %v141_v22, %v143_v23 }
 0x11e   :  { %200 = vmatpush.xpose.msk.msra.mxu2 %vm119_vm1, %v144_v24 }
 0x121   :  { %201 = vmatmul.msk.f32.vlgmr.msra.gmra.mxu2 %vm119_vm1, %v145_v25 }
 0x1a4   :  { %v175_v27 = vpop.f32.mrf.mxu2 }
 0x1a5   :  { %v176_v28 = vadd.f32 %v175_v27, %v150_v26 }
 0x1a7   :  { %179 = vst.msk [vmem:[#allocation8] sm:$0xff] %vm178_vm2, %v176_v28 }
 0x1a8   :  { %190 = dma.vmem_to_hbm [thread:$0]  %s186_s22, 128, %s188_s6, [#allocation4]  }
 0x1a9   :  { %312 = dma.done.wait [#allocation4], 128  }
 0x1aa   :  { %313 = vsyncadd [#allocation4], 4294967168 }
 0x1ab   :  { %195 = vsyncpa [#allocation3], 1 }
 0x1ac   :  { %196 = vsyncpa [#allocation6], 1 }
 0x1ad   :  { %197 = vsyncpa [#allocation4], 1 }

</bundles_post_ra>
